<compile_context>
chip_gen: v5e
topology: v5e:2x2
jax: 0.10.0
libtpu: 0.0.40
codegen_flags: <defaults>
</compile_context>

<pallas_src>
import jax
import jax.numpy as jnp
from jax.experimental import pallas as pl
from jax.experimental.pallas import tpu as pltpu


_NEG = -1e30  # padding value for padded class columns (softmax-neutral)


def _round_up(x, m):
    return ((x + m - 1) // m) * m


def _suffix_ce_kernel(logits_ref, targets_ref, out_ref, m_ref, l_ref, p_ref):
    """Per-token CE with ignore_index=0; online LSE over class tiles."""
    k = pl.program_id(1)
    nk = pl.num_programs(1)

    @pl.when(k == 0)
    def _():
        m_ref[...] = jnp.full_like(m_ref, _NEG)
        l_ref[...] = jnp.zeros_like(l_ref)
        p_ref[...] = jnp.zeros_like(p_ref)

    x = logits_ref[...].astype(jnp.float32)         # (TR, TC), upcast in-kernel
    tgt = targets_ref[...]                          # (TR, 1) int32
    tr, tc = x.shape

    # Gather the target-class logit with compare-select + reduce.
    # Class tile k covers global classes [k*tc, (k+1)*tc).
    classes = jax.lax.broadcasted_iota(jnp.int32, (tr, tc), 1) + k * tc
    picked = jnp.sum(jnp.where(classes == tgt, x, 0.0), axis=-1, keepdims=True)

    # Online (streaming) log-sum-exp across class tiles.
    m_tile = jnp.max(x, axis=-1, keepdims=True)
    m_new = jnp.maximum(m_ref[...], m_tile)
    l_ref[...] = l_ref[...] * jnp.exp(m_ref[...] - m_new) + jnp.sum(
        jnp.exp(x - m_new), axis=-1, keepdims=True)
    m_ref[...] = m_new
    p_ref[...] = p_ref[...] + picked

    @pl.when(k == nk - 1)
    def _():
        lse = jnp.log(l_ref[...]) + m_ref[...]      # (TR, 1)
        loss = lse - p_ref[...]                     # per-token cross entropy
        loss = jnp.where(tgt != 0, loss, 0.0)       # ignore_index = 0
        out_ref[...] = jnp.broadcast_to(loss, out_ref.shape)  # lane-dense store


def suffix_length_normalized_ce_loss(logits, targets):
    """logits: (B, W, C) float32 or bfloat16; targets: (B, W) integer labels.

    Returns a scalar float32 loss matching the PyTorch module's forward.
    NOTE: like the PyTorch reference, an instance whose targets are all 0
    yields 0/0 -> NaN (callers must provide a non-empty suffix per instance),
    and targets must lie in [0, C) (PyTorch would raise otherwise).
    """
    B, W, C = logits.shape
    N = B * W
    targets = targets.astype(jnp.int32)

    logits2 = logits.reshape(N, C)          # no dtype cast in the wrapper
    tgt2 = targets.reshape(N, 1)

    # Tile sizes: lane-dense class tiles (multiple of 128), sublane-aligned
    # row tiles (multiple of 8).
    tc = min(2048, _round_up(C, 128))
    c_pad = _round_up(C, tc)
    tr = min(256, _round_up(N, 8))
    n_pad = _round_up(N, tr)

    if c_pad > C:
        logits2 = jnp.pad(logits2, ((0, 0), (0, c_pad - C)),
                          constant_values=_NEG)
    if n_pad > N:
        logits2 = jnp.pad(logits2, ((0, n_pad - N), (0, 0)))
        tgt2 = jnp.pad(tgt2, ((0, n_pad - N), (0, 0)))

    grid = (n_pad // tr, c_pad // tc)

    # Explicit scoped-VMEM budget: double-buffered logits tile + targets +
    # output tile + scratch, with headroom (capped well under v7x's 64 MiB).
    logits_bytes = tr * tc * jnp.dtype(logits2.dtype).itemsize
    vmem_bytes = 2 * logits_bytes + 8 * tr * 128 * 4 + (1 << 20)
    vmem_bytes = int(min(max(vmem_bytes, 4 << 20), 48 << 20))

    out = pl.pallas_call(
        _suffix_ce_kernel,
        out_shape=jax.ShapeDtypeStruct((n_pad, 128), jnp.float32),
        grid_spec=pltpu.PrefetchScalarGridSpec(
            num_scalar_prefetch=0,
            grid=grid,
            in_specs=[
                pl.BlockSpec((tr, tc), lambda i, k: (i, k)),
                pl.BlockSpec((tr, 1), lambda i, k: (i, 0)),
            ],
            out_specs=pl.BlockSpec((tr, 128), lambda i, k: (i, 0)),
            scratch_shapes=[pltpu.VMEM((tr, 1), jnp.float32)] * 3,
        ),
        compiler_params=pltpu.CompilerParams(
            dimension_semantics=("parallel", "arbitrary"),
            vmem_limit_bytes=vmem_bytes,
        ),
    )(logits2, tgt2)

    # Tiny tail (B*W scalars): suffix-length normalization + batch mean.
    token_loss = out[:N, 0].reshape(B, W)   # masked per-token CE from kernel
    suf_len = jnp.sum((targets != 0).astype(jnp.float32), axis=-1)
    normalized = jnp.sum(token_loss, axis=-1) / suf_len
    return jnp.mean(normalized)


def _reference_loss(logits, targets):
    # Pure-JAX reference mirroring nn.CrossEntropyLoss(reduction='none',
    # ignore_index=0) followed by suffix-length normalization.
    logp = jax.nn.log_softmax(logits.astype(jnp.float32), axis=-1)
    picked = jnp.take_along_axis(
        logp, targets[..., None].astype(jnp.int32), axis=-1)[..., 0]
    token_loss = -picked * (targets != 0).astype(jnp.float32)
    suf_len = jnp.sum((targets != 0).astype(jnp.float32), axis=-1)
    return jnp.mean(jnp.sum(token_loss, axis=-1) / suf_len)


if __name__ == "__main__":
    key = jax.random.PRNGKey(0)
    k1, k2, k3, k4 = jax.random.split(key, 4)

    # Case 1: small shapes implied by the module (batch=2, window=8,
    # num_classes=32) -- single-tile grid, padded-lane path.
    B, W, C = 2, 8, 32
    logits = jax.random.normal(k1, (B, W, C), dtype=jnp.float32)
    targets = jax.random.randint(k2, (B, W), 0, C, dtype=jnp.int32)
    targets = targets.at[:, 0].set(jnp.maximum(targets[:, 0], 1))  # non-empty suffix
    targets = targets.at[:, W - 2:].set(0)                         # padding tokens

    loss = jax.block_until_ready(suffix_length_normalized_ce_loss(logits, targets))
    ref = jax.block_until_ready(_reference_loss(logits, targets))
    assert jnp.allclose(loss, ref, rtol=1e-5, atol=1e-5), (loss, ref)

    # Case 2: exercises row padding and multiple class tiles (online LSE).
    B2, W2, C2 = 3, 17, 3000
    logits_b = jax.random.normal(k3, (B2, W2, C2), dtype=jnp.float32)
    targets_b = jax.random.randint(k4, (B2, W2), 0, C2, dtype=jnp.int32)
    targets_b = targets_b.at[:, 0].set(jnp.maximum(targets_b[:, 0], 1))
    targets_b = targets_b.at[:, W2 - 5:].set(0)

    loss2 = jax.block_until_ready(
        suffix_length_normalized_ce_loss(logits_b, targets_b))
    ref2 = jax.block_until_ready(_reference_loss(logits_b, targets_b))
    assert jnp.allclose(loss2, ref2, rtol=1e-5, atol=1e-4), (loss2, ref2)

    print("KERNEL_OK")
</pallas_src>

<mosaic_0001>
module attributes {stable_mosaic.version = 11 : i64} {
  func.func @_suffix_ce_kernel(%arg0: i32, %arg1: i32, %arg2: memref<16x128xf32, #tpu.memory_space<vmem>>, %arg3: memref<16x1xi32, #tpu.memory_space<vmem>>, %arg4: memref<16x128xf32, #tpu.memory_space<vmem>>, %arg5: memref<16x1xf32, #tpu.memory_space<vmem>>, %arg6: memref<16x1xf32, #tpu.memory_space<vmem>>, %arg7: memref<16x1xf32, #tpu.memory_space<vmem>>) attributes {dimension_semantics = [#tpu.dimension_semantics<parallel>, #tpu.dimension_semantics<arbitrary>], iteration_bounds = array<i64: 1, 1>, scalar_prefetch = 0 : i64, scratch_operands = 3 : i64, tpu.core_type = #tpu.core_type<tc>, window_params = [{transform_indices = @transform_0, window_bounds = array<i64: 16, 128>}, {transform_indices = @transform_1, window_bounds = array<i64: 16, 1>}, {transform_indices = @transform_2, window_bounds = array<i64: 16, 128>}]} {
    %c0_i32 = arith.constant 0 : i32
    %0 = arith.cmpi eq, %arg1, %c0_i32 : i32
    %1 = arith.extui %0 : i1 to i32
    %c0_i32_0 = arith.constant 0 : i32
    %2 = arith.cmpi ne, %1, %c0_i32_0 : i32
    scf.if %2 {
      %cst_23 = arith.constant -1.000000e+30 : f32
      %38 = vector.broadcast %cst_23 : f32 to vector<16x1xf32>
      %c0_24 = arith.constant 0 : index
      %c0_25 = arith.constant 0 : index
      %39 = vector.load %arg5[%c0_24, %c0_25] : memref<16x1xf32, #tpu.memory_space<vmem>>, vector<16x1xf32>
      tpu.vector_store %arg5[%c0_24, %c0_25], %38 {strides = array<i32>} : memref<16x1xf32, #tpu.memory_space<vmem>>, vector<16x1xf32>,
      %cst_26 = arith.constant 0.000000e+00 : f32
      %40 = vector.broadcast %cst_26 : f32 to vector<16x1xf32>
      %c0_27 = arith.constant 0 : index
      %c0_28 = arith.constant 0 : index
      %41 = vector.load %arg6[%c0_27, %c0_28] : memref<16x1xf32, #tpu.memory_space<vmem>>, vector<16x1xf32>
      tpu.vector_store %arg6[%c0_27, %c0_28], %40 {strides = array<i32>} : memref<16x1xf32, #tpu.memory_space<vmem>>, vector<16x1xf32>,
      %cst_29 = arith.constant 0.000000e+00 : f32
      %42 = vector.broadcast %cst_29 : f32 to vector<16x1xf32>
      %c0_30 = arith.constant 0 : index
      %c0_31 = arith.constant 0 : index
      %43 = vector.load %arg7[%c0_30, %c0_31] : memref<16x1xf32, #tpu.memory_space<vmem>>, vector<16x1xf32>
      tpu.vector_store %arg7[%c0_30, %c0_31], %42 {strides = array<i32>} : memref<16x1xf32, #tpu.memory_space<vmem>>, vector<16x1xf32>,
    } else {
    }
    %c0 = arith.constant 0 : index
    %c0_1 = arith.constant 0 : index
    %3 = vector.load %arg2[%c0, %c0_1] : memref<16x128xf32, #tpu.memory_space<vmem>>, vector<16x128xf32>
    %c0_2 = arith.constant 0 : index
    %c0_3 = arith.constant 0 : index
    %4 = vector.load %arg3[%c0_2, %c0_3] : memref<16x1xi32, #tpu.memory_space<vmem>>, vector<16x1xi32>
    %5 = tpu.iota {dimensions = array<i32: 1>} : vector<16x128xi32>
    %c128_i32 = arith.constant 128 : i32
    %6 = arith.muli %arg1, %c128_i32 : i32
    %7 = vector.broadcast %6 : i32 to vector<16x128xi32>
    %8 = arith.addi %5, %7 : vector<16x128xi32>
    %9 = vector.broadcast %4 : vector<16x1xi32> to vector<16x128xi32>
    %10 = arith.cmpi eq, %8, %9 : vector<16x128xi32>
    %cst = arith.constant 0.000000e+00 : f32
    %11 = vector.broadcast %cst : f32 to vector<16x128xf32>
    %12 = arith.select %10, %3, %11 : vector<16x128xi1>, vector<16x128xf32>
    %cst_4 = arith.constant dense<0.000000e+00> : vector<16xf32>
    %13 = vector.multi_reduction <add>, %12, %cst_4 [1] : vector<16x128xf32> to vector<16xf32>
    %14 = vector.shape_cast %13 : vector<16xf32> to vector<16x1xf32>
    %cst_5 = arith.constant dense<0xFF800000> : vector<16xf32>
    %15 = vector.multi_reduction <maximumf>, %3, %cst_5 [1] : vector<16x128xf32> to vector<16xf32>
    %16 = vector.shape_cast %15 : vector<16xf32> to vector<16x1xf32>
    %c0_6 = arith.constant 0 : index
    %c0_7 = arith.constant 0 : index
    %17 = vector.load %arg5[%c0_6, %c0_7] : memref<16x1xf32, #tpu.memory_space<vmem>>, vector<16x1xf32>
    %18 = arith.maximumf %17, %16 : vector<16x1xf32>
    %c0_8 = arith.constant 0 : index
    %c0_9 = arith.constant 0 : index
    %19 = vector.load %arg6[%c0_8, %c0_9] : memref<16x1xf32, #tpu.memory_space<vmem>>, vector<16x1xf32>
    %c0_10 = arith.constant 0 : index
    %c0_11 = arith.constant 0 : index
    %20 = vector.load %arg5[%c0_10, %c0_11] : memref<16x1xf32, #tpu.memory_space<vmem>>, vector<16x1xf32>
    %21 = arith.subf %20, %18 : vector<16x1xf32>
    %22 = math.exp %21 : vector<16x1xf32>
    %23 = arith.mulf %19, %22 : vector<16x1xf32>
    %24 = vector.broadcast %18 : vector<16x1xf32> to vector<16x128xf32>
    %25 = arith.subf %3, %24 : vector<16x128xf32>
    %26 = math.exp %25 : vector<16x128xf32>
    %cst_12 = arith.constant dense<0.000000e+00> : vector<16xf32>
    %27 = vector.multi_reduction <add>, %26, %cst_12 [1] : vector<16x128xf32> to vector<16xf32>
    %28 = vector.shape_cast %27 : vector<16xf32> to vector<16x1xf32>
    %29 = arith.addf %23, %28 : vector<16x1xf32>
    %c0_13 = arith.constant 0 : index
    %c0_14 = arith.constant 0 : index
    %30 = vector.load %arg6[%c0_13, %c0_14] : memref<16x1xf32, #tpu.memory_space<vmem>>, vector<16x1xf32>
    tpu.vector_store %arg6[%c0_13, %c0_14], %29 {strides = array<i32>} : memref<16x1xf32, #tpu.memory_space<vmem>>, vector<16x1xf32>,
    %c0_15 = arith.constant 0 : index
    %c0_16 = arith.constant 0 : index
    %31 = vector.load %arg5[%c0_15, %c0_16] : memref<16x1xf32, #tpu.memory_space<vmem>>, vector<16x1xf32>
    tpu.vector_store %arg5[%c0_15, %c0_16], %18 {strides = array<i32>} : memref<16x1xf32, #tpu.memory_space<vmem>>, vector<16x1xf32>,
    %c0_17 = arith.constant 0 : index
    %c0_18 = arith.constant 0 : index
    %32 = vector.load %arg7[%c0_17, %c0_18] : memref<16x1xf32, #tpu.memory_space<vmem>>, vector<16x1xf32>
    %33 = arith.addf %32, %14 : vector<16x1xf32>
    %c0_19 = arith.constant 0 : index
    %c0_20 = arith.constant 0 : index
    %34 = vector.load %arg7[%c0_19, %c0_20] : memref<16x1xf32, #tpu.memory_space<vmem>>, vector<16x1xf32>
    tpu.vector_store %arg7[%c0_19, %c0_20], %33 {strides = array<i32>} : memref<16x1xf32, #tpu.memory_space<vmem>>, vector<16x1xf32>,
    %c0_i32_21 = arith.constant 0 : i32
    %35 = arith.cmpi eq, %arg1, %c0_i32_21 : i32
    %36 = arith.extui %35 : i1 to i32
    %c0_i32_22 = arith.constant 0 : i32
    %37 = arith.cmpi ne, %36, %c0_i32_22 : i32
    scf.if %37 {
      %c0_23 = arith.constant 0 : index
      %c0_24 = arith.constant 0 : index
      %38 = vector.load %arg6[%c0_23, %c0_24] : memref<16x1xf32, #tpu.memory_space<vmem>>, vector<16x1xf32>
      %39 = math.log %38 : vector<16x1xf32>
      %c0_25 = arith.constant 0 : index
      %c0_26 = arith.constant 0 : index
      %40 = vector.load %arg5[%c0_25, %c0_26] : memref<16x1xf32, #tpu.memory_space<vmem>>, vector<16x1xf32>
      %41 = arith.addf %39, %40 : vector<16x1xf32>
      %c0_27 = arith.constant 0 : index
      %c0_28 = arith.constant 0 : index
      %42 = vector.load %arg7[%c0_27, %c0_28] : memref<16x1xf32, #tpu.memory_space<vmem>>, vector<16x1xf32>
      %43 = arith.subf %41, %42 : vector<16x1xf32>
      %c0_i32_29 = arith.constant 0 : i32
      %44 = vector.broadcast %c0_i32_29 : i32 to vector<16x1xi32>
      %45 = arith.cmpi ne, %4, %44 : vector<16x1xi32>
      %cst_30 = arith.constant 0.000000e+00 : f32
      %46 = vector.broadcast %cst_30 : f32 to vector<16x1xf32>
      %47 = arith.select %45, %43, %46 : vector<16x1xi1>, vector<16x1xf32>
      %48 = vector.shape_cast %47 : vector<16x1xf32> to vector<16x1xf32>
      %49 = vector.broadcast %48 : vector<16x1xf32> to vector<16x128xf32>
      %c0_31 = arith.constant 0 : index
      %c0_32 = arith.constant 0 : index
      %50 = vector.load %arg4[%c0_31, %c0_32] : memref<16x128xf32, #tpu.memory_space<vmem>>, vector<16x128xf32>
      tpu.vector_store %arg4[%c0_31, %c0_32], %49 {strides = array<i32>} : memref<16x128xf32, #tpu.memory_space<vmem>>, vector<16x128xf32>,
    } else {
    }
    return
  }
  func.func @transform_0(%arg0: i32, %arg1: i32) -> (i32, i32) {
    %c0_i32 = arith.constant 0 : i32
    return %arg0, %arg1 : i32, i32
  }
  func.func @transform_1(%arg0: i32, %arg1: i32) -> (i32, i32) {
    %c0_i32 = arith.constant 0 : i32
    %c0_i32_0 = arith.constant 0 : i32
    return %arg0, %c0_i32 : i32, i32
  }
  func.func @transform_2(%arg0: i32, %arg1: i32) -> (i32, i32) {
    %c0_i32 = arith.constant 0 : i32
    %c0_i32_0 = arith.constant 0 : i32
    return %arg0, %c0_i32 : i32, i32
  }
}

</mosaic_0001>

<bundles_post_ra>
// kernel: tpu_custom_call.1
= control target key start
LH: loop header
LB: loop body
LE: loop exit
PB: predicated region body
PF: predicated region fallthrough
CT: control target
= control target key end

     0   :  { %s251_s0 = inlined_call_operand.vmem [shape: f32[16,128], index: 0, kind: input, shape index: {}]   ;;  %s252_s1 = inlined_call_operand.vmem [shape: s32[16,1], index: 1, kind: input, shape index: {}]   ;;  %s253_s2 = inlined_call_operand.hbm [shape: f32[16,128], index: 2, kind: output, shape index: {}]  }
   0x1   :  { %v23_v0 = vld [vmem:[%s251_s0] sm:$0xff] }
   0x2   :  { %7 = vsyncpa [#allocation6], 0  ;;  %46 = vmax.xlane.f32.xlu0 %v23_v0  ;;  %v24_v1 = vld [vmem:[%s251_s0 + $0x8] sm:$0xff]  ;;  %vm16_vm0 = vcmask 7168   ;;  %v195_v2 = vmov -1e+30   ;;  %v27_v15 = vlaneseq }
   0x3   :  { %17 = vst.msk [vmem:[#allocation2] sm:$0xff] %vm16_vm0, %v195_v2  ;;  %v196_v3 = vmov 0   ;;  %v197_v4 = vmov 0.0   ;;  %v231_v5 = vld [vmem:[%s252_s1] sm:$0xff]  ;;  %v237_v6 = vld [vmem:[%s252_s1 + $0x8] sm:$0xff]  ;;  %s198_s1 = smov [#allocation5]  }
   0x4   :  { %18 = vst.msk [vmem:[#allocation2 + $0x8] sm:$0xff] %vm16_vm0, %v195_v2  ;;  %154 = vset.pattern.permute.xlu1 %v196_v3  ;;  %155 = vset.pattern.permute.xlu2 %v196_v3  ;;  %v28_v16 = vand.u32 127, %v27_v15  ;;  %vm114_vm3 = vcmp.ne.s32.totalorder %v231_v5, 0  ;;  %vm115_vm4 = vcmp.ne.s32.totalorder %v237_v6, 0  ;;  %s134_s16 = sshll.u32 %s198_s1, 4  ;;  %s136_s19 = sshll.u32 %s253_s2, 4  ;;  %s135_s16 = int_to_ptr.vmem [resolvable:$true] %s134_s16  ;;  %s137_s19 = int_to_ptr.hbm [resolvable:$true] %s136_s19 }
   0x5   :  { %156 = vset.pattern.permute.xlu0 %v196_v3  ;;  %19 = vst.msk [vmem:[#allocation3] sm:$0xff] %vm16_vm0, %v197_v4  ;;  %33 = vperm.xlu2 %155, %v231_v5   ;;  %s199_s20 = smov 128   ;;  %s200_s21 = smov 8  }
   0x6   :  { %20 = vst.msk [vmem:[#allocation3 + $0x8] sm:$0xff] %vm16_vm0, %v197_v4 }
   0x7   :  { %21 = vst.msk [vmem:[#allocation4] sm:$0xff] %vm16_vm0, %v197_v4 }
   0x8   :  { %22 = vst.msk [vmem:[#allocation4 + $0x8] sm:$0xff] %vm16_vm0, %v197_v4 }
   0xa   :  { %48 = vmax.xlane.f32.xlu0 %v24_v1  ;;  %v50_v7 = vld [vmem:[#allocation2] sm:$0xff] }
   0xb   :  { %v51_v11 = vld [vmem:[#allocation2 + $0x8] sm:$0xff] }
   0xc   :  { %v54_v35 = vld [vmem:[#allocation3] sm:$0xff] }
   0xd   :  { %36 = vperm.xlu2 %155, %v237_v6   ;;  %v55_v40 = vld [vmem:[#allocation3 + $0x8] sm:$0xff] }
   0xe   :  { %v91_v30 = vld [vmem:[#allocation4] sm:$0xff] }
   0xf   :  { %v92_v41 = vld [vmem:[#allocation4 + $0x8] sm:$0xff] }
  0x5f   :  { %v34_v17 = vpop.permute.xlu2 %33 }
  0x60   :  { %vm38_vm1 = vcmp.eq.s32.totalorder %v28_v16, %v34_v17 }
  0x61   :  { %v40_v18 = vsel %vm38_vm1, %v23_v0, 0.0 }
  0x62   :  { %42 = vadd.xlane.f32.xlu2 %v40_v18 }
  0x67   :  { %v37_v26 = vpop.permute.xlu2 %36 }
  0x68   :  { %vm39_vm2 = vcmp.eq.s32.totalorder %v28_v16, %v37_v26 }
  0x69   :  { %v41_v27 = vsel %vm39_vm2, %v24_v1, 0.0 }
  0x75   :  { %v47_v8 = vpop.xlane.xlu0 %46 }
  0x76   :  { %v52_v9 = vmax.f32 %v50_v7, %v47_v8 }
  0x78   :  { %v56_v10 = vsub.f32 %v50_v7, %v52_v9  ;;  %89 = vst.msk [vmem:[#allocation2] sm:$0xff] %vm16_vm0, %v52_v9  ;;  %66 = vperm.xlu1 %154, %v52_v9  }
  0x7a   :  { %v58_v32 = vmul.f32 1.442695, %v56_v10 }
  0x7d   :  { %v49_v12 = vpop.xlane.xlu0 %48 }
  0x7e   :  { %v53_v13 = vmax.f32 %v51_v11, %v49_v12 }
  0x7f   :  { %v106_v51 = vld [vmem:[#allocation2] sm:$0xff] }
  0x80   :  { %v57_v14 = vsub.f32 %v51_v11, %v53_v13  ;;  %90 = vst.msk [vmem:[#allocation2 + $0x8] sm:$0xff] %vm16_vm0, %v53_v13  ;;  %71 = vperm.xlu1 %154, %v53_v13  }
  0x82   :  { %v60_v33 = vmul.f32 1.442695, %v57_v14 }
  0x87   :  { %v107_v58 = vld [vmem:[#allocation2 + $0x8] sm:$0xff] }
  0xd5   :  { %v43_v29 = vpop.xlane.xlu2 %42 }
  0xd6   :  { %v93_v31 = vadd.f32 %v91_v30, %v43_v29 }
  0xd8   :  { %95 = vst.msk [vmem:[#allocation4] sm:$0xff] %vm16_vm0, %v93_v31 }
  0xdf   :  { %v110_v52 = vld [vmem:[#allocation4] sm:$0xff] }
  0xea   :  { %v67_v19 = vpop.permute.xlu1 %66 }
  0xeb   :  { %v74_v20 = vsub.f32 %v23_v0, %v67_v19 }
  0xed   :  { %v76_v21 = vmul.f32 1.442695, %v74_v20 }
  0xef   :  { %157 = vpow2.f32 %v76_v21 }
  0xf2   :  { %v72_v22 = vpop.permute.xlu1 %71 }
  0xf3   :  { %v75_v23 = vsub.f32 %v24_v1, %v72_v22 }
  0xf5   :  { %v158_v24 = vpop.eup %157  ;;  %v78_v25 = vmul.f32 1.442695, %v75_v23 }
  0xf6   :  { %80 = vadd.xlane.f32.xlu0 %v158_v24 }
  0xf7   :  { %159 = vpow2.f32 %v78_v25 }
  0xf8   :  { %161 = vpow2.f32 %v58_v32 }
  0xf9   :  { %163 = vpow2.f32 %v60_v33 }
  0xfd   :  { %v160_v28 = vpop.eup %159 }
  0xfe   :  { %82 = vadd.xlane.f32.xlu1 %v160_v28  ;;  %44 = vadd.xlane.f32.xlu0 %v41_v27  ;;  %v162_v34 = vpop.eup %161 }
  0xff   :  { %v62_v36 = vmul.f32 %v162_v34, %v54_v35  ;;  %v164_v39 = vpop.eup %163 }
 0x100   :  { %v63_v42 = vmul.f32 %v164_v39, %v55_v40 }
 0x169   :  { %v81_v37 = vpop.xlane.xlu0 %80 }
 0x16a   :  { %v84_v38 = vadd.f32 %v81_v37, %v62_v36 }
 0x16c   :  { %87 = vst.msk [vmem:[#allocation3] sm:$0xff] %vm16_vm0, %v84_v38 }
 0x171   :  { %v83_v43 = vpop.xlane.xlu1 %82  ;;  %v45_v44 = vpop.xlane.xlu0 %44 }
 0x172   :  { %v85_v45 = vadd.f32 %v83_v43, %v63_v42  ;;  %v94_v46 = vadd.f32 %v92_v41, %v45_v44 }
 0x173   :  { %v100_v47 = vld [vmem:[#allocation3] sm:$0xff] }
 0x174   :  { %88 = vst.msk [vmem:[#allocation3 + $0x8] sm:$0xff] %vm16_vm0, %v85_v45  ;;  %165 = vlog2.f32 %v100_v47 }
 0x175   :  { %96 = vst.msk [vmem:[#allocation4 + $0x8] sm:$0xff] %vm16_vm0, %v94_v46 }
 0x17a   :  { %v166_v48 = vpop.eup %165 }
 0x17b   :  { %v103_v49 = vmul.f32 0.6931472, %v166_v48  ;;  %v101_v50 = vld [vmem:[#allocation3 + $0x8] sm:$0xff] }
 0x17c   :  { %167 = vlog2.f32 %v101_v50  ;;  %v111_v60 = vld [vmem:[#allocation4 + $0x8] sm:$0xff] }
 0x17d   :  { %v108_v53 = vadd.f32 %v106_v51, %v103_v49 }
 0x17f   :  { %v112_v54 = vsub.f32 %v108_v53, %v110_v52 }
 0x181   :  { %v116_v55 = vsel %vm114_vm3, %v112_v54, 0.0 }
 0x182   :  { %v168_v56 = vpop.eup %167  ;;  %120 = vperm.xlu0 %156, %v116_v55  }
 0x183   :  { %v105_v57 = vmul.f32 0.6931472, %v168_v56 }
 0x185   :  { %v109_v59 = vadd.f32 %v107_v58, %v105_v57 }
 0x187   :  { %v113_v61 = vsub.f32 %v109_v59, %v111_v60 }
 0x189   :  { %v117_v62 = vsel %vm115_vm4, %v113_v61, 0.0 }
 0x18a   :  { %125 = vperm.xlu2 %155, %v117_v62  }
 0x1e4   :  { %v126_v63 = vpop.permute.xlu2 %125 }
 0x1e5   :  { %129 = vst [vmem:[#allocation5 + $0x8] sm:$0xff] %v126_v63 }
 0x1f4   :  { %v121_v0 = vpop.permute.xlu0 %120 }
 0x1f5   :  { %128 = vst [vmem:[#allocation5] sm:$0xff] %v121_v0 }
 0x1f6   :  { %142 = dma.vmem_to_hbm [thread:$0]  %s135_s16, 256, %s137_s19, [#allocation6], %s199_s20, %s199_s20, %s200_s21  }
 0x1f7   :  { %193 = dma.done.wait [#allocation6], 256  }
 0x1f8   :  { %194 = vsyncadd [#allocation6], 4294967040 }
 0x1f9   :  { %147 = vsyncpa [#allocation6], 1 }

</bundles_post_ra>
